<compile_context>
chip_gen: v6e
topology: v6e:2x2x1
jax: 0.10.0
libtpu: 0.0.40
codegen_flags: <defaults>
</compile_context>

<pallas_src>
import jax
import jax.numpy as jnp
from jax.experimental import pallas as pl
from jax.experimental.pallas import tpu as pltpu


_VMEM_LIMIT_BYTES = 32 * 1024 * 1024   # scoped VMEM: v6e/v7x default, raises v5e's 16 MiB
_VMEM_BUDGET_BYTES = 24 * 1024 * 1024  # budget for pipeline buffers + in-kernel live values
_MAX_ROWS = 8192                       # keep per-op vreg counts / codegen size sane


def _logreg_kernel(x_ref, w_ref, b_ref, o_ref):
    # x_ref: (tB, D) VMEM in the caller's dtype; w_ref: (1, D) f32 VMEM (grid-resident);
    # b_ref: (1,) f32 SMEM; o_ref: (tB, 1) f32 VMEM.
    x = x_ref[...].astype(jnp.float32)            # cast after the (narrow) HBM load
    w = w_ref[...]                                # (1, D) broadcasts over the batch rows
    # VPU multiply + XLU lane reduce; exact f32 accumulation, MXU stays idle.
    s = jnp.sum(x * w, axis=-1, keepdims=True)    # (tB, 1)
    o_ref[...] = s + b_ref[0]                     # scalar bias read from SMEM


def federated_logistic_regression_forward(x, w, b=None, *, block_rows=None):
    """x: (B, D), w: (1, D) or (D,), b: (1,) or None -> (B,) f32 logits
    (== nn.Linear(D, 1, bias=b is not None)(x).view(-1))."""
    x = jnp.asarray(x)
    B, D = x.shape
    w2 = jnp.asarray(w, dtype=jnp.float32).reshape(1, D)
    if b is None:
        b2 = jnp.zeros((1,), dtype=jnp.float32)
    else:
        b2 = jnp.asarray(b, dtype=jnp.float32).reshape(1)

    in_isz = x.dtype.itemsize
    # Lane-padded row width: a (rows, D) VMEM block occupies ceil(D/128)*128 lanes.
    d_lanes = ((D + 127) // 128) * 128
    # Per-row VMEM bytes of a batch tile:
    #   2x double-buffered x input block (input dtype, lane padded)
    # + f32 working copies inside the kernel (cast/product; +1 copy for sub-f32 loads)
    # + 2x double-buffered (rows, 1) output block (pads its single lane to 128).
    per_row = (2 * d_lanes * in_isz
               + (2 + (1 if in_isz < 4 else 0)) * d_lanes * 4
               + 2 * 128 * 4)
    rows_cap = max(8, int(_VMEM_BUDGET_BYTES // per_row))
    rows_cap = min(rows_cap, _MAX_ROWS)
    if block_rows is not None:
        rows_cap = min(rows_cap, int(block_rows))

    if B <= rows_cap:
        tB = B                                   # single block == full array dims
        grid = (1,)
    else:
        sub = max(8, 8 * (4 // in_isz))          # 8 rows f32, 16 bf16, 32 int8/fp8
        align = 128 if rows_cap >= 128 else sub
        tB = max(sub, (rows_cap // align) * align)
        grid = (pl.cdiv(B, tB),)                 # ragged last block: reads clipped, OOB writes dropped

    out = pl.pallas_call(
        _logreg_kernel,
        out_shape=jax.ShapeDtypeStruct((B, 1), jnp.float32),
        grid_spec=pltpu.PrefetchScalarGridSpec(
            num_scalar_prefetch=0,
            grid=grid,
            in_specs=[
                pl.BlockSpec((tB, D), lambda i: (i, 0)),            # x: pipelined batch tiles
                pl.BlockSpec((1, D), lambda i: (0, 0)),             # w: stays resident
                pl.BlockSpec(memory_space=pltpu.MemorySpace.SMEM),  # bias scalar in SMEM
            ],
            out_specs=pl.BlockSpec((tB, 1), lambda i: (i, 0)),
        ),
        compiler_params=pltpu.CompilerParams(
            dimension_semantics=("parallel",),   # v7x: shard batch tiles across 2 TCs
            vmem_limit_bytes=_VMEM_LIMIT_BYTES,
        ),
        cost_estimate=pl.CostEstimate(
            flops=2 * B * D,
            transcendentals=0,
            bytes_accessed=B * D * in_isz + B * 4 + D * 4 + 4,
        ),
    )(x, w2, b2)

    # .view(-1) equivalent.
    return out.reshape(-1)


if __name__ == "__main__":
    key = jax.random.PRNGKey(0)
    kx, kw, kb, kx2 = jax.random.split(key, 4)

    # Small shapes consistent with the module: batch=8, dim=32.
    batch, dim = 8, 32
    bound = 1.0 / (dim ** 0.5)
    x = jax.random.normal(kx, (batch, dim), dtype=jnp.float32)
    w = jax.random.uniform(kw, (1, dim), minval=-bound, maxval=bound, dtype=jnp.float32)
    b = jax.random.uniform(kb, (1,), minval=-bound, maxval=bound, dtype=jnp.float32)

    logits = federated_logistic_regression_forward(x, w, b)
    jax.block_until_ready(logits)
    ref = jnp.sum(x * w, axis=-1) + b[0]          # exact f32 reference (== x @ w.T + b)
    assert logits.shape == (batch,)
    assert jnp.allclose(logits, ref, atol=1e-5, rtol=1e-5)

    # bf16 inputs pass straight through (no wrapper cast -> half the HBM bytes).
    logits_bf16 = federated_logistic_regression_forward(x.astype(jnp.bfloat16), w, b)
    jax.block_until_ready(logits_bf16)
    ref_bf16 = jnp.sum(x.astype(jnp.bfloat16).astype(jnp.float32) * w, axis=-1) + b[0]
    assert jnp.allclose(logits_bf16, ref_bf16, atol=1e-5, rtol=1e-5)

    # Exercise the multi-step pipelined grid with a ragged (unpadded) last block:
    # B=1000, tB=256 -> grid=(4,), last block covers rows 768..999 only.
    big_batch = 1000
    xb = jax.random.normal(kx2, (big_batch, dim), dtype=jnp.float32)
    logits_big = federated_logistic_regression_forward(xb, w, b, block_rows=256)
    jax.block_until_ready(logits_big)
    ref_big = jnp.sum(xb * w, axis=-1) + b[0]
    assert logits_big.shape == (big_batch,)
    assert jnp.allclose(logits_big, ref_big, atol=1e-5, rtol=1e-5)

    # TODO(synk): BCEWithLogitsLoss / train_step / test_step / prediction /
    # get_parameters / apply_parameters are loss & training utilities, not part of
    # forward(); not implemented as kernels.
    print("KERNEL_OK")
</pallas_src>

<mosaic_0001>
module attributes {stable_mosaic.version = 11 : i64} {
  func.func @_logreg_kernel(%arg0: i32, %arg1: memref<8x32xf32, #tpu.memory_space<vmem>>, %arg2: memref<1x32xf32, #tpu.memory_space<vmem>>, %arg3: memref<1xf32, #tpu.memory_space<smem>>, %arg4: memref<8x1xf32, #tpu.memory_space<vmem>>) attributes {dimension_semantics = [#tpu.dimension_semantics<parallel>], iteration_bounds = array<i64: 1>, scalar_prefetch = 0 : i64, scratch_operands = 0 : i64, tpu.core_type = #tpu.core_type<tc>, window_params = [{transform_indices = @transform_0, window_bounds = array<i64: 8, 32>}, {pipeline_mode = #tpu.pipeline_mode<synchronous>, transform_indices = @transform_1, window_bounds = array<i64: 1, 32>}, {transform_indices = @transform_2, window_bounds = array<i64: 1>}, {transform_indices = @transform_3, window_bounds = array<i64: 8, 1>}]} {
    %c0 = arith.constant 0 : index
    %c0_0 = arith.constant 0 : index
    %0 = vector.load %arg1[%c0, %c0_0] : memref<8x32xf32, #tpu.memory_space<vmem>>, vector<8x32xf32>
    %c0_1 = arith.constant 0 : index
    %c0_2 = arith.constant 0 : index
    %1 = vector.load %arg2[%c0_1, %c0_2] : memref<1x32xf32, #tpu.memory_space<vmem>>, vector<1x32xf32>
    %2 = vector.broadcast %1 : vector<1x32xf32> to vector<8x32xf32>
    %3 = arith.mulf %0, %2 : vector<8x32xf32>
    %cst = arith.constant dense<0.000000e+00> : vector<8xf32>
    %4 = vector.multi_reduction <add>, %3, %cst [1] : vector<8x32xf32> to vector<8xf32>
    %5 = vector.shape_cast %4 : vector<8xf32> to vector<8x1xf32>
    %c0_3 = arith.constant 0 : index
    %6 = memref.load %arg3[%c0_3] : memref<1xf32, #tpu.memory_space<smem>>
    %7 = vector.broadcast %6 : f32 to vector<8x1xf32>
    %8 = arith.addf %5, %7 : vector<8x1xf32>
    %c0_4 = arith.constant 0 : index
    %c0_5 = arith.constant 0 : index
    %9 = vector.load %arg4[%c0_4, %c0_5] : memref<8x1xf32, #tpu.memory_space<vmem>>, vector<8x1xf32>
    tpu.vector_store %arg4[%c0_4, %c0_5], %8 {strides = array<i32>} : memref<8x1xf32, #tpu.memory_space<vmem>>, vector<8x1xf32>,
    return
  }
  func.func @transform_0(%arg0: i32) -> (i32, i32) {
    %c0_i32 = arith.constant 0 : i32
    %c0_i32_0 = arith.constant 0 : i32
    return %arg0, %c0_i32 : i32, i32
  }
  func.func @transform_1(%arg0: i32) -> (i32, i32) {
    %c0_i32 = arith.constant 0 : i32
    %c0_i32_0 = arith.constant 0 : i32
    %c0_i32_1 = arith.constant 0 : i32
    return %c0_i32, %c0_i32_0 : i32, i32
  }
  func.func @transform_2(%arg0: i32) -> i32 {
    %c0_i32 = arith.constant 0 : i32
    %c0_i32_0 = arith.constant 0 : i32
    return %c0_i32 : i32
  }
  func.func @transform_3(%arg0: i32) -> (i32, i32) {
    %c0_i32 = arith.constant 0 : i32
    %c0_i32_0 = arith.constant 0 : i32
    return %arg0, %c0_i32 : i32, i32
  }
}

</mosaic_0001>

<bundles_post_ra>
// kernel: tpu_custom_call.1
= control target key start
LH: loop header
LB: loop body
LE: loop exit
PB: predicated region body
PF: predicated region fallthrough
CT: control target
= control target key end

     0   :  { %9 = vsyncpa [#allocation4], 0  ;;  %s74_s12 = smov [#allocation3]   ;;  %s107_s0 = inlined_call_operand.hbm [shape: f32[8,32], index: 0, kind: input, shape index: {}]   ;;  %s108_s1 = inlined_call_operand.vmem [shape: f32[1,32], index: 1, kind: input, shape index: {}]   ;;  %s109_s2 = inlined_call_operand.<no memory space> [shape: f32[1], index: 2, kind: input, shape index: {}]   ;;  %s110_s3 = inlined_call_operand.vmem [shape: f32[8,1], index: 3, kind: output, shape index: {}]  }
   0x1   :  { %s16_s13 = sshll.u32 %s74_s12, 4  ;;  %s17_s13 = int_to_ptr.vmem [resolvable:$true] %s16_s13 }
   0x2   :  { %s60_s14 = scalar_lea.vmem %s17_s13, 128  ;;  %p65_p1 = scmp.lt.s32.totalorder %s17_s13, %s17_s13 }
   0x3   :  { %p61_p0 = scmp.ne.s32.totalorder %s17_s13, %s60_s14  ;;  %p66_p2 = scmp.lt.s32.totalorder %s60_s14, %s60_s14 }
   0x5   :  { %p67_p3 = por %p66_p2, %p65_p1 }
   0x7   :  { %p68_p4 = pnand %p67_p3, %p61_p0 }
   0x9   :  { %71 = shalt.err (!%p68_p4)
}
   0xa   :  { %19 = dma.hbm_to_vmem [thread:$0]  %s107_s0, 128, %s17_s13, [#allocation4]  }
   0xb   :  { %72 = dma.done.wait [#allocation4], 128  }
   0xc   :  { %73 = vsyncadd [#allocation4], 4294967168  ;;  %v27_v0 = vld [vmem:[#allocation3] sm:$0xff]  ;;  %vm36_vm0 = vcmask 261120   ;;  %v41_v4 = vstv %s109_s2  ;;  %vm43_vm1 = vcmask 7168  }
   0xd   :  { %v50_v1 = vld [vmem:[%s108_s1] ss:$0 sm:$0xff] }
   0xe   :  { %v35_v2 = vmul.f32 %v50_v1, %v27_v0 }
  0x10   :  { %v37_v3 = vsel %vm36_vm0, %v35_v2, 0.0 }
  0x11   :  { %38 = vadd.xlane.f32.xlu0 %v37_v3 }
  0x9a   :  { %v39_v5 = vpop.xlane.xlu0 %38 }
  0x9b   :  { %v42_v6 = vadd.f32 %v41_v4, %v39_v5 }
  0x9d   :  { %44 = vst.msk [vmem:[%s110_s3] sm:$0xff] %vm43_vm1, %v42_v6 }
  0x9e   :  { %49 = vsyncpa [#allocation4], 1 }

</bundles_post_ra>
